<compile_context>
chip_gen: v7x
topology: tpu7x:2x2x1
jax: 0.10.0
libtpu: 0.0.40
codegen_flags: <defaults>
</compile_context>

<pallas_src>
import functools

import numpy as np
import jax
import jax.numpy as jnp
from jax import lax
from jax.experimental import pallas as pl
from jax.experimental.pallas import tpu as pltpu

OBS_WIDTH = 256.0   # stand-in for cfg.SENSOR.OBS_WIDTH

# ---------------- problem sizes (small, shape-consistent) ----------------
B = 2          # batch
N = 16         # number of goal-object categories (original: 310)
F2 = 2 * N     # node-embedding width (original: 620)
H = 32         # fc1 hidden (original: 512)
N_OUT = N      # fc2 output (original: 310)
NP = int(pl.cdiv(N_OUT, 128) * 128)   # lane-padded fc2 output width


# ---------------- numpy glue (mirrors normalize_adj, no scipy) -----------
def normalize_adj(adj):
    adj = np.asarray(adj, dtype=np.float64)
    rowsum = adj.sum(1)
    d_inv_sqrt = np.power(rowsum, -0.5)
    d_inv_sqrt[np.isinf(d_inv_sqrt)] = 0.0
    # (adj @ D^-1/2)^T @ D^-1/2  ==  D^-1/2 adj^T D^-1/2
    A = (adj * d_inv_sqrt[None, :]).T * d_inv_sqrt[None, :]
    return A.astype(np.float32)


def build_graph_inputs(objbb_list, goal_obj_index_list):
    """Builds class_onehot (B,1,N) and objstate (B,N,5) like the torch loops."""
    b = len(objbb_list)
    class_onehot = np.zeros((b, 1, N), dtype=np.float32)
    objstate = np.zeros((b, N, 5), dtype=np.float32)
    for idx, objbb in enumerate(objbb_list):
        for bbox in objbb:
            x1, y1, x2, y2, cat_id = bbox
            ind = goal_obj_index_list.index(cat_id)
            class_onehot[idx, 0, ind] = 1.0
            objstate[idx, ind, 0] = 1.0
            objstate[idx, ind, 1] = (x1 / 2.0 + x2 / 2.0) / OBS_WIDTH
            objstate[idx, ind, 2] = (y1 / 2.0 + y2 / 2.0) / OBS_WIDTH
            objstate[idx, ind, 3] = abs(x2 - x1) * abs(y2 - y1) / (OBS_WIDTH * OBS_WIDTH)
            objstate[idx, ind, 4] = 1.0
    return class_onehot, objstate


# ---------------- Pallas kernel (hot path) --------------------------------
def _kg_kernel(bb, cdt,
               A_ref, rsum_ref, aw0b_ref, onehot_ref, obj_ref,
               w0ta_ref, w1t_ref, w2t_ref, w3a_ref, w3b_ref,
               fc1wt_ref, fc1b_ref, fc2wt_ref, fc2b_ref,
               out_ref):
    f32 = jnp.float32
    A = A_ref[...]                    # (N, N)  compute dtype (bf16 by default)
    rsum = rsum_ref[...]              # (N, 1)  f32  == A @ ones(N)
    aw0b = aw0b_ref[...]              # (N, F2) f32  == A @ W0^T[N:] (hoisted)

    # layer 0, batch-dependent half, batched over bb: one (bb,N)x(N,F2) pass
    V = jnp.dot(onehot_ref[...].astype(cdt), w0ta_ref[...],
                preferred_element_type=f32)                        # (bb, F2)

    pre_cols = []
    for b in range(bb):               # bounded unroll (bb <= 8; rest via grid)
        # layer 0:  relu(A @ [bcast(onehot)|I] @ W0^T)
        #         = relu(rowsum(A) (x) (onehot @ W0^T[:N])  +  A @ W0^T[N:])
        x = jnp.maximum(rsum * V[b:b + 1, :] + aw0b, 0.0)          # (N,F2) f32 VPU

        # layer 1
        x = jnp.dot(A, x.astype(cdt), preferred_element_type=f32)
        x = jnp.maximum(jnp.dot(x.astype(cdt), w1t_ref[...],
                                preferred_element_type=f32), 0.0)

        # layer 2
        x = jnp.dot(A, x.astype(cdt), preferred_element_type=f32)
        x = jnp.maximum(jnp.dot(x.astype(cdt), w2t_ref[...],
                                preferred_element_type=f32), 0.0)  # (N, 5)

        # layer 3 right-multiply with W3 split (no lane concat):
        #   concat(x, obj) @ W3^T == x @ W3^T[:5] + obj @ W3^T[5:]
        pre = (jnp.dot(x.astype(cdt), w3a_ref[...], preferred_element_type=f32)
               + jnp.dot(obj_ref[b].astype(cdt), w3b_ref[...],
                         preferred_element_type=f32))              # (N, 1)
        pre_cols.append(pre)

    # layer 3 A-propagation batched across the bb chains: one (N,N)x(N,bb) pass
    pre_stack = jnp.concatenate(pre_cols, axis=1)                  # (N, bb)
    x3 = jnp.maximum(jnp.dot(A, pre_stack.astype(cdt),
                             preferred_element_type=f32), 0.0)     # (N, bb)

    # fc1: contract the node axis on the MXU for all bb elements at once
    h = lax.dot_general(x3.astype(cdt), fc1wt_ref[...],
                        (((0,), (0,)), ((), ())),
                        preferred_element_type=f32)                # (bb, H)
    h = jnp.maximum(h + fc1b_ref[...], 0.0)

    # fc2 (lane-padded to NP): single unmasked store straight into out_ref
    out_ref[...] = (jnp.dot(h.astype(cdt), fc2wt_ref[...],
                            preferred_element_type=f32) + fc2b_ref[...])


def _default_batch_block(b, cap=8):
    bb = min(b, cap)
    while b % bb:
        bb -= 1
    return bb


def knowledge_graph_forward(A, class_onehot, objstate, params, *,
                            batch_block=None, compute_dtype=jnp.bfloat16):
    """A: (N,N); class_onehot: (B,1,N); objstate: (B,N,5) -> (B, N_OUT)."""
    b = class_onehot.shape[0]
    bb = _default_batch_block(b) if batch_block is None else int(batch_block)
    assert b % bb == 0
    grid = (b // bb,)
    cdt = compute_dtype

    # ---- wrapper-side prep (once per call, outside the kernel) ----
    A = A.astype(jnp.float32)
    rsum = jnp.sum(A, axis=1, keepdims=True)                       # (N, 1)
    w0t = params["W0"].T.astype(jnp.float32)                       # (F2, F2)
    w0ta = w0t[:N, :].astype(cdt)                                  # (N, F2)
    aw0b = jnp.dot(A, w0t[N:, :])                                  # (N, F2) f32, HOISTED
    w1t = params["W1"].T.astype(cdt)                               # (F2, F2)
    w2t = params["W2"].T.astype(cdt)                               # (F2, 5)
    w3t = params["W3"].T.astype(jnp.float32)                       # (10, 1)
    w3a = w3t[:5, :].astype(cdt)                                   # (5, 1)
    w3b = w3t[5:, :].astype(cdt)                                   # (5, 1)
    fc1wt = params["fc1_w"].T.astype(cdt)                          # (N, H)
    fc1b = params["fc1_b"][None, :].astype(jnp.float32)            # (1, H)
    # lane-pad fc2 so the final store is lane-dense / unmasked
    fc2wt = jnp.zeros((H, NP), jnp.float32).at[:, :N_OUT].set(
        params["fc2_w"].T).astype(cdt)                             # (H, NP)
    fc2b = jnp.zeros((1, NP), jnp.float32).at[:, :N_OUT].set(
        params["fc2_b"][None, :])                                  # (1, NP)
    onehot2d = class_onehot[:, 0, :].astype(jnp.float32)           # (B, N)
    objstate = objstate.astype(jnp.float32)                        # (B, N, 5)
    A_c = A.astype(cdt)

    args = (A_c, rsum, aw0b, onehot2d, objstate,
            w0ta, w1t, w2t, w3a, w3b, fc1wt, fc1b, fc2wt, fc2b)

    # advisory cost estimate for the whole call
    flops = b * (2 * N * F2                 # onehot @ W0^T[:N]
                 + 2 * (2 * N * N * F2)     # two A-propagations at width F2
                 + 2 * N * F2 * F2          # @ W1^T
                 + 2 * N * F2 * 5           # @ W2^T
                 + 2 * N * 5 * 2            # W3 split right-multiplies
                 + 2 * N * N                # A-propagation at width 1
                 + 2 * N * H                # fc1
                 + 2 * H * NP)              # fc2
    bytes_accessed = int(sum(int(a.size) * a.dtype.itemsize for a in args)
                         + b * NP * 4)

    in_specs = [
        pl.BlockSpec((N, N), lambda i: (0, 0)),            # A (compute dtype)
        pl.BlockSpec((N, 1), lambda i: (0, 0)),            # rowsum(A)
        pl.BlockSpec((N, F2), lambda i: (0, 0)),           # A @ W0^T[N:] (hoisted)
        pl.BlockSpec((bb, N), lambda i: (i, 0)),           # class_onehot (2D)
        pl.BlockSpec((bb, N, 5), lambda i: (i, 0, 0)),     # objstate
        pl.BlockSpec((N, F2), lambda i: (0, 0)),           # W0^T[:N]
        pl.BlockSpec((F2, F2), lambda i: (0, 0)),          # W1^T
        pl.BlockSpec((F2, 5), lambda i: (0, 0)),           # W2^T
        pl.BlockSpec((5, 1), lambda i: (0, 0)),            # W3^T[:5]
        pl.BlockSpec((5, 1), lambda i: (0, 0)),            # W3^T[5:]
        pl.BlockSpec((N, H), lambda i: (0, 0)),            # fc1_w^T
        pl.BlockSpec((1, H), lambda i: (0, 0)),            # fc1_b
        pl.BlockSpec((H, NP), lambda i: (0, 0)),           # fc2_w^T (padded)
        pl.BlockSpec((1, NP), lambda i: (0, 0)),           # fc2_b  (padded)
    ]

    out = pl.pallas_call(
        functools.partial(_kg_kernel, bb, cdt),
        out_shape=jax.ShapeDtypeStruct((b, NP), jnp.float32),
        grid_spec=pltpu.PrefetchScalarGridSpec(
            num_scalar_prefetch=0,
            grid=grid,
            in_specs=in_specs,
            out_specs=pl.BlockSpec((bb, NP), lambda i: (i, 0)),
        ),
        compiler_params=pltpu.CompilerParams(
            dimension_semantics=("parallel",)),
        # NOTE: at production sizes (N=310->320, F2=640, H=512) also set
        # vmem_limit_bytes explicitly here (v7x has only 64 MiB physical VMEM).
        cost_estimate=pl.CostEstimate(flops=flops, transcendentals=0,
                                      bytes_accessed=bytes_accessed),
    )(*args)
    return out[:, :N_OUT]


# ---------------- pure-JAX reference for verification ---------------------
def reference_forward(A, class_onehot, objstate, params):
    relu = jax.nn.relu
    b = class_onehot.shape[0]
    emb = jnp.concatenate(
        (jnp.broadcast_to(class_onehot, (b, N, N)),
         jnp.broadcast_to(jnp.eye(N, dtype=jnp.float32)[None], (b, N, N))),
        axis=2)                                               # (B, N, 2N)
    bmmA = lambda x: jnp.einsum("ij,bjk->bik", A, x)
    x = bmmA(emb)
    x = relu(x @ params["W0"].T)
    x = bmmA(x)
    x = relu(x @ params["W1"].T)
    x = bmmA(x)
    x = relu(x @ params["W2"].T)
    x = jnp.concatenate((x, objstate), axis=2)
    x = bmmA(x)
    x = relu(x @ params["W3"].T)
    x = x.reshape(b, -1)
    x = relu(x @ params["fc1_w"].T + params["fc1_b"])
    return x @ params["fc2_w"].T + params["fc2_b"]


if __name__ == "__main__":
    key = jax.random.PRNGKey(0)
    ks = jax.random.split(key, 10)

    # --- synthetic adjacency (stand-in for LVIS_relationships.pbz2) ---
    adj = np.asarray(jax.random.uniform(ks[0], (N, N), jnp.float32))
    adj = (adj + adj.T) / 2.0
    adj = adj.astype("float32") + 1e-5
    A = jnp.asarray(normalize_adj(adj))

    # --- deterministic parameters (nn.Linear weight layout: (out, in)) ---
    params = {
        "W0": jax.random.normal(ks[1], (F2, F2), jnp.float32) * 0.1,
        "W1": jax.random.normal(ks[2], (F2, F2), jnp.float32) * 0.1,
        "W2": jax.random.normal(ks[3], (5, F2), jnp.float32) * 0.1,
        "W3": jax.random.normal(ks[4], (1, 10), jnp.float32) * 0.1,
        "fc1_w": jax.random.normal(ks[5], (H, N), jnp.float32) * 0.1,
        "fc1_b": jax.random.normal(ks[6], (H,), jnp.float32) * 0.1,
        "fc2_w": jax.random.normal(ks[7], (N_OUT, H), jnp.float32) * 0.1,
        "fc2_b": jax.random.normal(ks[8], (N_OUT,), jnp.float32) * 0.1,
    }

    # --- synthetic detection inputs (objbb_list / goal_obj_index_list) ---
    goal_obj_index_list = list(range(100, 100 + N))       # arbitrary category ids
    objbb_list = [
        [(10.0, 20.0, 60.0, 90.0, 103), (5.0, 5.0, 40.0, 30.0, 110)],
        [(100.0, 50.0, 200.0, 150.0, 100), (30.0, 60.0, 80.0, 120.0, 115),
         (0.0, 0.0, 25.0, 25.0, 107)],
    ]
    # target_obj_list is unused by the original forward; kept for signature parity.
    target_obj_list = [103, 100]

    onehot_np, objstate_np = build_graph_inputs(objbb_list, goal_obj_index_list)
    class_onehot = jnp.asarray(onehot_np)
    objstate = jnp.asarray(objstate_np)

    y_ref = reference_forward(A, class_onehot, objstate, params)

    # default: whole (toy) batch fused into one kernel step, bf16 dot operands
    y_pred = knowledge_graph_forward(A, class_onehot, objstate, params)
    y_pred = jax.block_until_ready(y_pred)
    np.testing.assert_allclose(np.asarray(y_pred), np.asarray(y_ref),
                               rtol=2e-2, atol=2e-2)

    # multi-grid-step path (what production batches / the v7x 2-TC split use):
    # verifies the hoisted aw0b + per-step batch tiling.  At toy sizes this is
    # a correctness check only -- keep grid=(1,) for B=2 in practice.
    y_pred_split = knowledge_graph_forward(A, class_onehot, objstate, params,
                                           batch_block=1)
    y_pred_split = jax.block_until_ready(y_pred_split)
    np.testing.assert_allclose(np.asarray(y_pred_split), np.asarray(y_ref),
                               rtol=2e-2, atol=2e-2)

    # f32 fallback: checks the algebraic restructuring at tight tolerance
    y_pred_f32 = knowledge_graph_forward(A, class_onehot, objstate, params,
                                         compute_dtype=jnp.float32)
    y_pred_f32 = jax.block_until_ready(y_pred_f32)
    np.testing.assert_allclose(np.asarray(y_pred_f32), np.asarray(y_ref),
                               rtol=1e-4, atol=1e-4)

    print("KERNEL_OK")
</pallas_src>

<mosaic_0001>
module attributes {stable_mosaic.version = 11 : i64} {
  func.func @_kg_kernel(%arg0: i32, %arg1: memref<16x16xbf16, #tpu.memory_space<vmem>>, %arg2: memref<16x1xf32, #tpu.memory_space<vmem>>, %arg3: memref<16x32xf32, #tpu.memory_space<vmem>>, %arg4: memref<2x16xf32, #tpu.memory_space<vmem>>, %arg5: memref<2x16x5xf32, #tpu.memory_space<vmem>>, %arg6: memref<16x32xbf16, #tpu.memory_space<vmem>>, %arg7: memref<32x32xbf16, #tpu.memory_space<vmem>>, %arg8: memref<32x5xbf16, #tpu.memory_space<vmem>>, %arg9: memref<5x1xbf16, #tpu.memory_space<vmem>>, %arg10: memref<5x1xbf16, #tpu.memory_space<vmem>>, %arg11: memref<16x32xbf16, #tpu.memory_space<vmem>>, %arg12: memref<1x32xf32, #tpu.memory_space<vmem>>, %arg13: memref<32x128xbf16, #tpu.memory_space<vmem>>, %arg14: memref<1x128xf32, #tpu.memory_space<vmem>>, %arg15: memref<2x128xf32, #tpu.memory_space<vmem>>) attributes {dimension_semantics = [#tpu.dimension_semantics<parallel>], iteration_bounds = array<i64: 1>, scalar_prefetch = 0 : i64, scratch_operands = 0 : i64, tpu.core_type = #tpu.core_type<tc>, window_params = [{pipeline_mode = #tpu.pipeline_mode<synchronous>, transform_indices = @transform_0, window_bounds = array<i64: 16, 16>}, {pipeline_mode = #tpu.pipeline_mode<synchronous>, transform_indices = @transform_1, window_bounds = array<i64: 16, 1>}, {pipeline_mode = #tpu.pipeline_mode<synchronous>, transform_indices = @transform_2, window_bounds = array<i64: 16, 32>}, {transform_indices = @transform_3, window_bounds = array<i64: 2, 16>}, {transform_indices = @transform_4, window_bounds = array<i64: 2, 16, 5>}, {pipeline_mode = #tpu.pipeline_mode<synchronous>, transform_indices = @transform_5, window_bounds = array<i64: 16, 32>}, {pipeline_mode = #tpu.pipeline_mode<synchronous>, transform_indices = @transform_6, window_bounds = array<i64: 32, 32>}, {pipeline_mode = #tpu.pipeline_mode<synchronous>, transform_indices = @transform_7, window_bounds = array<i64: 32, 5>}, {pipeline_mode = #tpu.pipeline_mode<synchronous>, transform_indices = @transform_8, window_bounds = array<i64: 5, 1>}, {pipeline_mode = #tpu.pipeline_mode<synchronous>, transform_indices = @transform_9, window_bounds = array<i64: 5, 1>}, {pipeline_mode = #tpu.pipeline_mode<synchronous>, transform_indices = @transform_10, window_bounds = array<i64: 16, 32>}, {pipeline_mode = #tpu.pipeline_mode<synchronous>, transform_indices = @transform_11, window_bounds = array<i64: 1, 32>}, {pipeline_mode = #tpu.pipeline_mode<synchronous>, transform_indices = @transform_12, window_bounds = array<i64: 32, 128>}, {pipeline_mode = #tpu.pipeline_mode<synchronous>, transform_indices = @transform_13, window_bounds = array<i64: 1, 128>}, {transform_indices = @transform_14, window_bounds = array<i64: 2, 128>}]} {
    %c0 = arith.constant 0 : index
    %c0_0 = arith.constant 0 : index
    %0 = vector.load %arg1[%c0, %c0_0] : memref<16x16xbf16, #tpu.memory_space<vmem>>, vector<16x16xbf16>
    %c0_1 = arith.constant 0 : index
    %c0_2 = arith.constant 0 : index
    %1 = vector.load %arg2[%c0_1, %c0_2] : memref<16x1xf32, #tpu.memory_space<vmem>>, vector<16x1xf32>
    %c0_3 = arith.constant 0 : index
    %c0_4 = arith.constant 0 : index
    %2 = vector.load %arg3[%c0_3, %c0_4] : memref<16x32xf32, #tpu.memory_space<vmem>>, vector<16x32xf32>
    %c0_5 = arith.constant 0 : index
    %c0_6 = arith.constant 0 : index
    %3 = vector.load %arg4[%c0_5, %c0_6] : memref<2x16xf32, #tpu.memory_space<vmem>>, vector<2x16xf32>
    %4 = arith.truncf %3 : vector<2x16xf32> to vector<2x16xbf16>
    %c0_7 = arith.constant 0 : index
    %c0_8 = arith.constant 0 : index
    %5 = vector.load %arg6[%c0_7, %c0_8] : memref<16x32xbf16, #tpu.memory_space<vmem>>, vector<16x32xbf16>
    %cst = arith.constant dense<0.000000e+00> : vector<2x32xf32>
    %6 = tpu.matmul %4, %5, %cst {dimension_numbers = #tpu.dot_dimension_numbers<[1], [0], [0], [1], [0, 0, 1, 1], [], []>} : vector<2x16xbf16>, vector<16x32xbf16>, vector<2x32xf32> -> vector<2x32xf32>
    %7 = vector.extract_strided_slice %6 {offsets = [0, 0], sizes = [1, 32], strides = [1, 1]} : vector<2x32xf32> to vector<1x32xf32>
    %8 = vector.broadcast %1 : vector<16x1xf32> to vector<16x32xf32>
    %9 = vector.broadcast %7 : vector<1x32xf32> to vector<16x32xf32>
    %10 = arith.mulf %8, %9 : vector<16x32xf32>
    %11 = arith.addf %10, %2 : vector<16x32xf32>
    %cst_9 = arith.constant 0.000000e+00 : f32
    %12 = vector.broadcast %cst_9 : f32 to vector<16x32xf32>
    %13 = arith.maximumf %11, %12 : vector<16x32xf32>
    %14 = arith.truncf %13 : vector<16x32xf32> to vector<16x32xbf16>
    %cst_10 = arith.constant dense<0.000000e+00> : vector<16x32xf32>
    %15 = tpu.matmul %0, %14, %cst_10 {dimension_numbers = #tpu.dot_dimension_numbers<[1], [0], [0], [1], [0, 0, 1, 1], [], []>} : vector<16x16xbf16>, vector<16x32xbf16>, vector<16x32xf32> -> vector<16x32xf32>
    %16 = arith.truncf %15 : vector<16x32xf32> to vector<16x32xbf16>
    %c0_11 = arith.constant 0 : index
    %c0_12 = arith.constant 0 : index
    %17 = vector.load %arg7[%c0_11, %c0_12] : memref<32x32xbf16, #tpu.memory_space<vmem>>, vector<32x32xbf16>
    %cst_13 = arith.constant dense<0.000000e+00> : vector<16x32xf32>
    %18 = tpu.matmul %16, %17, %cst_13 {dimension_numbers = #tpu.dot_dimension_numbers<[1], [0], [0], [1], [0, 0, 1, 1], [], []>} : vector<16x32xbf16>, vector<32x32xbf16>, vector<16x32xf32> -> vector<16x32xf32>
    %cst_14 = arith.constant 0.000000e+00 : f32
    %19 = vector.broadcast %cst_14 : f32 to vector<16x32xf32>
    %20 = arith.maximumf %18, %19 : vector<16x32xf32>
    %21 = arith.truncf %20 : vector<16x32xf32> to vector<16x32xbf16>
    %cst_15 = arith.constant dense<0.000000e+00> : vector<16x32xf32>
    %22 = tpu.matmul %0, %21, %cst_15 {dimension_numbers = #tpu.dot_dimension_numbers<[1], [0], [0], [1], [0, 0, 1, 1], [], []>} : vector<16x16xbf16>, vector<16x32xbf16>, vector<16x32xf32> -> vector<16x32xf32>
    %23 = arith.truncf %22 : vector<16x32xf32> to vector<16x32xbf16>
    %c0_16 = arith.constant 0 : index
    %c0_17 = arith.constant 0 : index
    %24 = vector.load %arg8[%c0_16, %c0_17] : memref<32x5xbf16, #tpu.memory_space<vmem>>, vector<32x5xbf16>
    %cst_18 = arith.constant dense<0.000000e+00> : vector<16x5xf32>
    %25 = tpu.matmul %23, %24, %cst_18 {dimension_numbers = #tpu.dot_dimension_numbers<[1], [0], [0], [1], [0, 0, 1, 1], [], []>} : vector<16x32xbf16>, vector<32x5xbf16>, vector<16x5xf32> -> vector<16x5xf32>
    %cst_19 = arith.constant 0.000000e+00 : f32
    %26 = vector.broadcast %cst_19 : f32 to vector<16x5xf32>
    %27 = arith.maximumf %25, %26 : vector<16x5xf32>
    %28 = arith.truncf %27 : vector<16x5xf32> to vector<16x5xbf16>
    %c0_20 = arith.constant 0 : index
    %c0_21 = arith.constant 0 : index
    %29 = vector.load %arg9[%c0_20, %c0_21] : memref<5x1xbf16, #tpu.memory_space<vmem>>, vector<5x1xbf16>
    %cst_22 = arith.constant dense<0.000000e+00> : vector<16x1xf32>
    %30 = tpu.matmul %28, %29, %cst_22 {dimension_numbers = #tpu.dot_dimension_numbers<[1], [0], [0], [1], [0, 0, 1, 1], [], []>} : vector<16x5xbf16>, vector<5x1xbf16>, vector<16x1xf32> -> vector<16x1xf32>
    %c0_23 = arith.constant 0 : index
    %c0_24 = arith.constant 0 : index
    %c0_25 = arith.constant 0 : index
    %31 = vector.load %arg5[%c0_23, %c0_24, %c0_25] : memref<2x16x5xf32, #tpu.memory_space<vmem>>, vector<1x16x5xf32>
    %32 = vector.shape_cast %31 : vector<1x16x5xf32> to vector<16x5xf32>
    %33 = arith.truncf %32 : vector<16x5xf32> to vector<16x5xbf16>
    %c0_26 = arith.constant 0 : index
    %c0_27 = arith.constant 0 : index
    %34 = vector.load %arg10[%c0_26, %c0_27] : memref<5x1xbf16, #tpu.memory_space<vmem>>, vector<5x1xbf16>
    %cst_28 = arith.constant dense<0.000000e+00> : vector<16x1xf32>
    %35 = tpu.matmul %33, %34, %cst_28 {dimension_numbers = #tpu.dot_dimension_numbers<[1], [0], [0], [1], [0, 0, 1, 1], [], []>} : vector<16x5xbf16>, vector<5x1xbf16>, vector<16x1xf32> -> vector<16x1xf32>
    %36 = arith.addf %30, %35 : vector<16x1xf32>
    %37 = vector.extract_strided_slice %6 {offsets = [1, 0], sizes = [1, 32], strides = [1, 1]} : vector<2x32xf32> to vector<1x32xf32>
    %38 = vector.broadcast %1 : vector<16x1xf32> to vector<16x32xf32>
    %39 = vector.broadcast %37 : vector<1x32xf32> to vector<16x32xf32>
    %40 = arith.mulf %38, %39 : vector<16x32xf32>
    %41 = arith.addf %40, %2 : vector<16x32xf32>
    %cst_29 = arith.constant 0.000000e+00 : f32
    %42 = vector.broadcast %cst_29 : f32 to vector<16x32xf32>
    %43 = arith.maximumf %41, %42 : vector<16x32xf32>
    %44 = arith.truncf %43 : vector<16x32xf32> to vector<16x32xbf16>
    %cst_30 = arith.constant dense<0.000000e+00> : vector<16x32xf32>
    %45 = tpu.matmul %0, %44, %cst_30 {dimension_numbers = #tpu.dot_dimension_numbers<[1], [0], [0], [1], [0, 0, 1, 1], [], []>} : vector<16x16xbf16>, vector<16x32xbf16>, vector<16x32xf32> -> vector<16x32xf32>
    %46 = arith.truncf %45 : vector<16x32xf32> to vector<16x32xbf16>
    %c0_31 = arith.constant 0 : index
    %c0_32 = arith.constant 0 : index
    %47 = vector.load %arg7[%c0_31, %c0_32] : memref<32x32xbf16, #tpu.memory_space<vmem>>, vector<32x32xbf16>
    %cst_33 = arith.constant dense<0.000000e+00> : vector<16x32xf32>
    %48 = tpu.matmul %46, %47, %cst_33 {dimension_numbers = #tpu.dot_dimension_numbers<[1], [0], [0], [1], [0, 0, 1, 1], [], []>} : vector<16x32xbf16>, vector<32x32xbf16>, vector<16x32xf32> -> vector<16x32xf32>
    %cst_34 = arith.constant 0.000000e+00 : f32
    %49 = vector.broadcast %cst_34 : f32 to vector<16x32xf32>
    %50 = arith.maximumf %48, %49 : vector<16x32xf32>
    %51 = arith.truncf %50 : vector<16x32xf32> to vector<16x32xbf16>
    %cst_35 = arith.constant dense<0.000000e+00> : vector<16x32xf32>
    %52 = tpu.matmul %0, %51, %cst_35 {dimension_numbers = #tpu.dot_dimension_numbers<[1], [0], [0], [1], [0, 0, 1, 1], [], []>} : vector<16x16xbf16>, vector<16x32xbf16>, vector<16x32xf32> -> vector<16x32xf32>
    %53 = arith.truncf %52 : vector<16x32xf32> to vector<16x32xbf16>
    %c0_36 = arith.constant 0 : index
    %c0_37 = arith.constant 0 : index
    %54 = vector.load %arg8[%c0_36, %c0_37] : memref<32x5xbf16, #tpu.memory_space<vmem>>, vector<32x5xbf16>
    %cst_38 = arith.constant dense<0.000000e+00> : vector<16x5xf32>
    %55 = tpu.matmul %53, %54, %cst_38 {dimension_numbers = #tpu.dot_dimension_numbers<[1], [0], [0], [1], [0, 0, 1, 1], [], []>} : vector<16x32xbf16>, vector<32x5xbf16>, vector<16x5xf32> -> vector<16x5xf32>
    %cst_39 = arith.constant 0.000000e+00 : f32
    %56 = vector.broadcast %cst_39 : f32 to vector<16x5xf32>
    %57 = arith.maximumf %55, %56 : vector<16x5xf32>
    %58 = arith.truncf %57 : vector<16x5xf32> to vector<16x5xbf16>
    %c0_40 = arith.constant 0 : index
    %c0_41 = arith.constant 0 : index
    %59 = vector.load %arg9[%c0_40, %c0_41] : memref<5x1xbf16, #tpu.memory_space<vmem>>, vector<5x1xbf16>
    %cst_42 = arith.constant dense<0.000000e+00> : vector<16x1xf32>
    %60 = tpu.matmul %58, %59, %cst_42 {dimension_numbers = #tpu.dot_dimension_numbers<[1], [0], [0], [1], [0, 0, 1, 1], [], []>} : vector<16x5xbf16>, vector<5x1xbf16>, vector<16x1xf32> -> vector<16x1xf32>
    %c1 = arith.constant 1 : index
    %c0_43 = arith.constant 0 : index
    %c0_44 = arith.constant 0 : index
    %61 = vector.load %arg5[%c1, %c0_43, %c0_44] : memref<2x16x5xf32, #tpu.memory_space<vmem>>, vector<1x16x5xf32>
    %62 = vector.shape_cast %61 : vector<1x16x5xf32> to vector<16x5xf32>
    %63 = arith.truncf %62 : vector<16x5xf32> to vector<16x5xbf16>
    %c0_45 = arith.constant 0 : index
    %c0_46 = arith.constant 0 : index
    %64 = vector.load %arg10[%c0_45, %c0_46] : memref<5x1xbf16, #tpu.memory_space<vmem>>, vector<5x1xbf16>
    %cst_47 = arith.constant dense<0.000000e+00> : vector<16x1xf32>
    %65 = tpu.matmul %63, %64, %cst_47 {dimension_numbers = #tpu.dot_dimension_numbers<[1], [0], [0], [1], [0, 0, 1, 1], [], []>} : vector<16x5xbf16>, vector<5x1xbf16>, vector<16x1xf32> -> vector<16x1xf32>
    %66 = arith.addf %60, %65 : vector<16x1xf32>
    %67 = tpu.concatenate %36, %66 in 1 : vector<16x1xf32>, vector<16x1xf32> -> vector<16x2xf32>
    %68 = arith.truncf %67 : vector<16x2xf32> to vector<16x2xbf16>
    %cst_48 = arith.constant dense<0.000000e+00> : vector<16x2xf32>
    %69 = tpu.matmul %0, %68, %cst_48 {dimension_numbers = #tpu.dot_dimension_numbers<[1], [0], [0], [1], [0, 0, 1, 1], [], []>} : vector<16x16xbf16>, vector<16x2xbf16>, vector<16x2xf32> -> vector<16x2xf32>
    %cst_49 = arith.constant 0.000000e+00 : f32
    %70 = vector.broadcast %cst_49 : f32 to vector<16x2xf32>
    %71 = arith.maximumf %69, %70 : vector<16x2xf32>
    %72 = arith.truncf %71 : vector<16x2xf32> to vector<16x2xbf16>
    %c0_50 = arith.constant 0 : index
    %c0_51 = arith.constant 0 : index
    %73 = vector.load %arg11[%c0_50, %c0_51] : memref<16x32xbf16, #tpu.memory_space<vmem>>, vector<16x32xbf16>
    %cst_52 = arith.constant dense<0.000000e+00> : vector<2x32xf32>
    %74 = tpu.matmul %72, %73, %cst_52 {dimension_numbers = #tpu.dot_dimension_numbers<[0], [0], [1], [1], [0, 1, 1, 1], [], []>} : vector<16x2xbf16>, vector<16x32xbf16>, vector<2x32xf32> -> vector<2x32xf32>
    %c0_53 = arith.constant 0 : index
    %c0_54 = arith.constant 0 : index
    %75 = vector.load %arg12[%c0_53, %c0_54] : memref<1x32xf32, #tpu.memory_space<vmem>>, vector<1x32xf32>
    %76 = vector.broadcast %75 : vector<1x32xf32> to vector<2x32xf32>
    %77 = arith.addf %74, %76 : vector<2x32xf32>
    %cst_55 = arith.constant 0.000000e+00 : f32
    %78 = vector.broadcast %cst_55 : f32 to vector<2x32xf32>
    %79 = arith.maximumf %77, %78 : vector<2x32xf32>
    %80 = arith.truncf %79 : vector<2x32xf32> to vector<2x32xbf16>
    %c0_56 = arith.constant 0 : index
    %c0_57 = arith.constant 0 : index
    %81 = vector.load %arg13[%c0_56, %c0_57] : memref<32x128xbf16, #tpu.memory_space<vmem>>, vector<32x128xbf16>
    %cst_58 = arith.constant dense<0.000000e+00> : vector<2x128xf32>
    %82 = tpu.matmul %80, %81, %cst_58 {dimension_numbers = #tpu.dot_dimension_numbers<[1], [0], [0], [1], [0, 0, 1, 1], [], []>} : vector<2x32xbf16>, vector<32x128xbf16>, vector<2x128xf32> -> vector<2x128xf32>
    %c0_59 = arith.constant 0 : index
    %c0_60 = arith.constant 0 : index
    %83 = vector.load %arg14[%c0_59, %c0_60] : memref<1x128xf32, #tpu.memory_space<vmem>>, vector<1x128xf32>
    %84 = vector.broadcast %83 : vector<1x128xf32> to vector<2x128xf32>
    %85 = arith.addf %82, %84 : vector<2x128xf32>
    %c0_61 = arith.constant 0 : index
    %c0_62 = arith.constant 0 : index
    %86 = vector.load %arg15[%c0_61, %c0_62] : memref<2x128xf32, #tpu.memory_space<vmem>>, vector<2x128xf32>
    tpu.vector_store %arg15[%c0_61, %c0_62], %85 {strides = array<i32>} : memref<2x128xf32, #tpu.memory_space<vmem>>, vector<2x128xf32>,
    return
  }
  func.func @transform_0(%arg0: i32) -> (i32, i32) {
    %c0_i32 = arith.constant 0 : i32
    %c0_i32_0 = arith.constant 0 : i32
    %c0_i32_1 = arith.constant 0 : i32
    return %c0_i32, %c0_i32_0 : i32, i32
  }
  func.func @transform_1(%arg0: i32) -> (i32, i32) {
    %c0_i32 = arith.constant 0 : i32
    %c0_i32_0 = arith.constant 0 : i32
    %c0_i32_1 = arith.constant 0 : i32
    return %c0_i32, %c0_i32_0 : i32, i32
  }
  func.func @transform_2(%arg0: i32) -> (i32, i32) {
    %c0_i32 = arith.constant 0 : i32
    %c0_i32_0 = arith.constant 0 : i32
    %c0_i32_1 = arith.constant 0 : i32
    return %c0_i32, %c0_i32_0 : i32, i32
  }
  func.func @transform_3(%arg0: i32) -> (i32, i32) {
    %c0_i32 = arith.constant 0 : i32
    %c0_i32_0 = arith.constant 0 : i32
    return %arg0, %c0_i32 : i32, i32
  }
  func.func @transform_4(%arg0: i32) -> (i32, i32, i32) {
    %c0_i32 = arith.constant 0 : i32
    %c0_i32_0 = arith.constant 0 : i32
    %c0_i32_1 = arith.constant 0 : i32
    return %arg0, %c0_i32, %c0_i32_0 : i32, i32, i32
  }
  func.func @transform_5(%arg0: i32) -> (i32, i32) {
    %c0_i32 = arith.constant 0 : i32
    %c0_i32_0 = arith.constant 0 : i32
    %c0_i32_1 = arith.constant 0 : i32
    return %c0_i32, %c0_i32_0 : i32, i32
  }
  func.func @transform_6(%arg0: i32) -> (i32, i32) {
    %c0_i32 = arith.constant 0 : i32
    %c0_i32_0 = arith.constant 0 : i32
    %c0_i32_1 = arith.constant 0 : i32
    return %c0_i32, %c0_i32_0 : i32, i32
  }
  func.func @transform_7(%arg0: i32) -> (i32, i32) {
    %c0_i32 = arith.constant 0 : i32
    %c0_i32_0 = arith.constant 0 : i32
    %c0_i32_1 = arith.constant 0 : i32
    return %c0_i32, %c0_i32_0 : i32, i32
  }
  func.func @transform_8(%arg0: i32) -> (i32, i32) {
    %c0_i32 = arith.constant 0 : i32
    %c0_i32_0 = arith.constant 0 : i32
    %c0_i32_1 = arith.constant 0 : i32
    return %c0_i32, %c0_i32_0 : i32, i32
  }
  func.func @transform_9(%arg0: i32) -> (i32, i32) {
    %c0_i32 = arith.constant 0 : i32
    %c0_i32_0 = arith.constant 0 : i32
    %c0_i32_1 = arith.constant 0 : i32
    return %c0_i32, %c0_i32_0 : i32, i32
  }
  func.func @transform_10(%arg0: i32) -> (i32, i32) {
    %c0_i32 = arith.constant 0 : i32
    %c0_i32_0 = arith.constant 0 : i32
    %c0_i32_1 = arith.constant 0 : i32
    return %c0_i32, %c0_i32_0 : i32, i32
  }
  func.func @transform_11(%arg0: i32) -> (i32, i32) {
    %c0_i32 = arith.constant 0 : i32
    %c0_i32_0 = arith.constant 0 : i32
    %c0_i32_1 = arith.constant 0 : i32
    return %c0_i32, %c0_i32_0 : i32, i32
  }
  func.func @transform_12(%arg0: i32) -> (i32, i32) {
    %c0_i32 = arith.constant 0 : i32
    %c0_i32_0 = arith.constant 0 : i32
    %c0_i32_1 = arith.constant 0 : i32
    return %c0_i32, %c0_i32_0 : i32, i32
  }
  func.func @transform_13(%arg0: i32) -> (i32, i32) {
    %c0_i32 = arith.constant 0 : i32
    %c0_i32_0 = arith.constant 0 : i32
    %c0_i32_1 = arith.constant 0 : i32
    return %c0_i32, %c0_i32_0 : i32, i32
  }
  func.func @transform_14(%arg0: i32) -> (i32, i32) {
    %c0_i32 = arith.constant 0 : i32
    %c0_i32_0 = arith.constant 0 : i32
    return %arg0, %c0_i32 : i32, i32
  }
}

</mosaic_0001>

<bundles_post_ra>
// kernel: tpu_custom_call.1
= control target key start
LH: loop header
LB: loop body
LE: loop exit
PB: predicated region body
PF: predicated region fallthrough
CT: control target
= control target key end

     0   :  { %v1172_v1 = vmov 0.0   ;;  %vm1173_vm0 = vmmov 0   ;;  %vm65_vm1 = vcmask 130048   ;;  %v1174_v5 = vmov 0   ;;  %s1415_s0 = inlined_call_operand.vmem [shape: bf16[16,16], index: 0, kind: input, shape index: {}]   ;;  %s1416_s1 = inlined_call_operand.vmem [shape: f32[16,1], index: 1, kind: input, shape index: {}]   ;;  %s1417_s2 = inlined_call_operand.vmem [shape: f32[16,32], index: 2, kind: input, shape index: {}]   ;;  %s1418_s3 = inlined_call_operand.vmem [shape: f32[2,16], index: 3, kind: input, shape index: {}]   ;;  %s1419_s4 = inlined_call_operand.vmem [shape: f32[2,16,5], index: 4, kind: input, shape index: {}]   ;;  %s1420_s5 = inlined_call_operand.vmem [shape: bf16[16,32], index: 5, kind: input, shape index: {}]   ;;  %s1421_s6 = inlined_call_operand.vmem [shape: bf16[32,32], index: 6, kind: input, shape index: {}]   ;;  %s1422_s7 = inlined_call_operand.vmem [shape: bf16[32,5], index: 7, kind: input, shape index: {}]   ;;  %s1423_s8 = inlined_call_operand.vmem [shape: bf16[5,1], index: 8, kind: input, shape index: {}]   ;;  %s1424_s9 = inlined_call_operand.vmem [shape: bf16[5,1], index: 9, kind: input, shape index: {}]   ;;  %s1425_s10 = inlined_call_operand.vmem [shape: bf16[16,32], index: 10, kind: input, shape index: {}]   ;;  %s1426_s11 = inlined_call_operand.vmem [shape: f32[1,32], index: 11, kind: input, shape index: {}]   ;;  %s1427_s12 = inlined_call_operand.vmem [shape: bf16[32,128], index: 12, kind: input, shape index: {}]   ;;  %s1428_s13 = inlined_call_operand.vmem [shape: f32[1,128], index: 13, kind: input, shape index: {}]   ;;  %s1429_s14 = inlined_call_operand.hbm [shape: f32[2,128], index: 14, kind: output, shape index: {}]  }
   0x1   :  { %v1139_v0 = vld [vmem:[%s1420_s5] sm:$0xff]   ;;  %1013 = vmatprep.subr.bf16.mxu0 %v1172_v1  ;;  %1019 = vmatprep.subr.bf16.mxu1 %v1172_v1  ;;  %v52_v6 = vld [vmem:[%s1416_s1 + $0x8] sm:$0xff] }
   0x2   :  { %v55_v2 = vld [vmem:[%s1418_s3] sm:$0x3]  ;;  %1014 = vmatpush3.bf16.msra.mxu0 %v1139_v0  ;;  %1015 = vmatprep.mubr.msk.bf16.mxu0 %vm1173_vm0, %v1172_v1 }
   0x3   :  { %v51_v3 = vld [vmem:[%s1416_s1] sm:$0xff]  ;;  %v56_v4 = vpack.c.bf16 %v55_v2, %v55_v2  ;;  %1133 = vset.pattern.permute.xlu0 %v1174_v5  ;;  %1021 = vmatprep.mubr.msk.bf16.mxu1 %vm1173_vm0, %v1172_v1 }
   0x4   :  { %111 = vperm.xlu0 %1133, %v51_v3   ;;  %1025 = vmatprep.subr.bf16.mxu0 %v1172_v1 }
   0x5   :  { %1016 = vmatmul.mubr.msk.bf16.vlgmr.msra.gmra.mrb[0].mxu0 %vm65_vm1, %v56_v4 }
   0x6   :  { %1029 = vmatprep.mubr.msk.bf16.mxu0 %vm1173_vm0, %v1172_v1 }
   0x7   :  { %19 = vsyncpa [#allocation3], 0  ;;  %v1278_v7 = vld [vmem:[%s1421_s6] sm:$0xff]   ;;  %v119_v8 = vlaneseq  ;;  %v54_v20 = vld [vmem:[%s1417_s2 + $0x8] sm:$0xff]  ;;  %vm196_vm2 = vcmask 261120   ;;  %vm358_vm3 = vcmask 1041408  }
   0x8   :  { %116 = vperm.xlu0 %1133, %v52_v6   ;;  %1026 = vmatpush3.bf16.msra.mxu0 %v1278_v7  ;;  %v53_v19 = vld [vmem:[%s1417_s2] sm:$0xff]  ;;  %v1142_v37 = vld [vmem:[%s1421_s6 + $0x8] sm:$0xff]   ;;  %vm359_vm4 = vcmask 1042432   ;;  %v1175_v53 = vmov 65535   ;;  %vm354_vm5 = vcmask 39936   ;;  %vm742_vm6 = vcmask 7168  }
   0x9   :  { %1027 = vmatprep.subr.bf16.mxu0 %v1172_v1  ;;  %v120_v9 = vshrl.u32 %v119_v8, 7  ;;  %v1291_v36 = vld [vmem:[%s1415_s0] sm:$0xff]   ;;  %v1144_v51 = vld [vmem:[%s1422_s7 + $0x8] sm:$0xff]   ;;  %v360_v54 = vsel %vm358_vm3, 4294967295, %v1175_v53  ;;  %s1177_s0 = smov [#allocation2]  }
   0xa   :  { %v1308_v43 = vld [vmem:[%s1422_s7] sm:$0xff]   ;;  %v351_v56 = vld [vmem:[%s1419_s4 + $0x8] sm:$0xff]  ;;  %v361_v57 = vsel %vm359_vm4, %v360_v54, 0 }
   0xb   :  { %v121_v11 = vsub.s32 0, %v120_v9  ;;  %v455_v12 = vsub.s32 1, %v120_v9  ;;  %v353_v52 = vld [vmem:[%s1424_s9] sm:$0x7] }
   0xc   :  { %1028 = vmatpush3.bf16.msra.mxu0 %v1142_v37  ;;  %v350_v55 = vld [vmem:[%s1419_s4] sm:$0xff]  ;;  %v363_v58 = vand.u32 %v361_v57, %v353_v52 }
   0xd   :  { %1039 = vmatprep.subr.bf16.mxu0 %v1172_v1  ;;  %v352_v59 = vpack.c.bf16 %v351_v56, %v350_v55  ;;  %v349_v2 = vld [vmem:[%s1423_s8] sm:$0x7] }
   0xe   :  { %v410_v3 = vand.u32 %v361_v57, %v349_v2  ;;  %v1145_v54 = vld [vmem:[%s1425_s10] sm:$0xff]  }
  0x83   :  { %v112_v10 = vpop.permute.xlu0 %111 }
  0x87   :  { %v117_v17 = vpop.permute.xlu0 %116 }
  0xd8   :  { %v103_v13 = vpop.f32.mrb[0].mxu0 }
  0xd9   :  { %v122_v14 = vrot.slane %v103_v13, %v121_v11  ;;  %v456_v15 = vrot.slane %v103_v13, %v455_v12  ;;  %v1017_v16 = vpop.f32.mrb[1].mxu0 }
  0xda   :  { %v106_v18 = vpop.f32.mrb[2].mxu0 }
  0xdb   :  { %v123_v21 = vmul.f32 %v122_v14, %v112_v10  ;;  %v124_v22 = vmul.f32 %v122_v14, %v117_v17  ;;  %v457_v23 = vmul.f32 %v456_v15, %v112_v10  ;;  %v458_v24 = vmul.f32 %v456_v15, %v117_v17  ;;  %v1018_v25 = vpop.f32.mrb[3].mxu0 }
  0xdd   :  { %v125_v26 = vadd.f32 %v123_v21, %v53_v19  ;;  %v126_v27 = vadd.f32 %v124_v22, %v54_v20  ;;  %v459_v28 = vadd.f32 %v457_v23, %v53_v19  ;;  %v460_v29 = vadd.f32 %v458_v24, %v54_v20 }
  0xdf   :  { %v127_v30 = vmax.f32 %v125_v26, 0.0  ;;  %v128_v31 = vmax.f32 %v126_v27, 0.0  ;;  %v461_v32 = vmax.f32 %v459_v28, 0.0  ;;  %v462_v33 = vmax.f32 %v460_v29, 0.0  ;;  %v964_v27 = vld [vmem:[%s1419_s4 + $0x10] sm:$0xff]  ;;  %v965_v28 = vld [vmem:[%s1419_s4 + $0x18] sm:$0xff] }
  0xe0   :  { %v645_v29 = vpack.c.bf16 %v965_v28, %v964_v27  ;;  %s1176_s4 = smov 1  }
  0xe1   :  { %v129_v34 = vpack.c.bf16 %v128_v31, %v127_v30  ;;  %v463_v35 = vpack.c.bf16 %v462_v33, %v461_v32 }
  0xe3   :  { %1020 = vmatpush3.bf16.msra.mxu1 %v129_v34 }
  0xe4   :  { %1033 = vmatprep.subr.bf16.mxu1 %v1172_v1 }
  0xe6   :  { %1022 = vmatmul.mubr.msk.bf16.vlgmr.msra.gmra.mrb[0].mxu1 %vm65_vm1, %v1291_v36 }
  0xe7   :  { %1035 = vmatprep.mubr.msk.bf16.mxu1 %vm1173_vm0, %v1172_v1 }
 0x1b9   :  { %v172_v38 = vpop.f32.mrb[0].mxu1 }
 0x1ba   :  { %v1023_v39 = vpop.f32.mrb[1].mxu1 }
 0x1bb   :  { %v175_v40 = vpop.f32.mrb[2].mxu1 }
 0x1bc   :  { %v179_v41 = vpack.c.bf16 %v175_v40, %v172_v38  ;;  %v1024_v42 = vpop.f32.mrb[3].mxu1 }
 0x1be   :  { %1030 = vmatmul.mubr.msk.bf16.vlgmr.msra.gmra.mrb[4].mxu0 %vm196_vm2, %v179_v41 }
 0x1bf   :  { %1043 = vmatprep.mubr.msk.bf16.mxu0 %vm1173_vm0, %v1172_v1  ;;  %1040 = vmatpush3.bf16.msra.mxu0 %v1308_v43 }
 0x1c0   :  { %1041 = vmatprep.subr.bf16.mxu0 %v1172_v1 }
 0x1c3   :  { %1042 = vmatpush3.bf16.msra.mxu0 %v1144_v51 }
 0x1c4   :  { %1059 = vmatprep.subr.bf16.mxu0 %v1172_v1 }
 0x291   :  { %v234_v44 = vpop.f32.mrb[4].mxu0 }
 0x292   :  { %v1031_v45 = vpop.f32.mrb[5].mxu0  ;;  %v241_v47 = vmax.f32 %v234_v44, 0.0 }
 0x293   :  { %v237_v46 = vpop.f32.mrb[6].mxu0 }
 0x294   :  { %v242_v48 = vmax.f32 %v237_v46, 0.0  ;;  %v1032_v49 = vpop.f32.mrb[7].mxu0 }
 0x296   :  { %v243_v50 = vpack.c.bf16 %v242_v48, %v241_v47 }
 0x298   :  { %1034 = vmatpush3.bf16.msra.mxu1 %v243_v50 }
 0x299   :  { %1047 = vmatprep.subr.bf16.mxu1 %v1172_v1 }
 0x29b   :  { %1036 = vmatmul.mubr.msk.bf16.vlgmr.msra.gmra.mrb[4].mxu1 %vm65_vm1, %v1291_v36 }
 0x29c   :  { %1049 = vmatprep.mubr.msk.bf16.mxu1 %vm1173_vm0, %v1172_v1  ;;  %1048 = vmatpush3.bf16.msra.mxu1 %v363_v58 }
 0x29d   :  { %1053 = vmatprep.subr.bf16.mxu1 %v1172_v1 }
 0x2a3   :  { %1050 = vmatmul.mubr.msk.bf16.vlgmr.msra.gmra.mrb[8].mxu1 %vm354_vm5, %v352_v59 }
 0x2a4   :  { %1055 = vmatprep.mubr.msk.bf16.mxu1 %vm1173_vm0, %v1172_v1  ;;  %1054 = vmatpush3.bf16.msra.mxu1 %v410_v3 }
 0x2a5   :  { %1073 = vmatprep.subr.bf16.mxu1 %v1172_v1 }
 0x36e   :  { %v278_v60 = vpop.f32.mrb[4].mxu1 }
 0x36f   :  { %v1037_v61 = vpop.f32.mrb[5].mxu1 }
 0x370   :  { %v281_v62 = vpop.f32.mrb[6].mxu1 }
 0x371   :  { %v285_v63 = vpack.c.bf16 %v281_v62, %v278_v60  ;;  %v1038_v0 = vpop.f32.mrb[7].mxu1 }
 0x372   :  { %v969_v0 = vld [vmem:[%s1426_s11] ss:$0 sm:$0xff] }
 0x373   :  { %1044 = vmatmul.mubr.msk.bf16.vlgmr.msra.gmra.mrb[8].mxu0 %vm196_vm2, %v285_v63  ;;  %v1147_v63 = vld [vmem:[%s1427_s12 + $0x8] sm:$0xff]  }
 0x374   :  { %1060 = vmatpush3.bf16.msra.mxu0 %v463_v35  ;;  %1061 = vmatprep.mubr.msk.bf16.mxu0 %vm1173_vm0, %v1172_v1 }
 0x375   :  { %1065 = vmatprep.subr.bf16.mxu0 %v1172_v1 }
 0x37b   :  { %1062 = vmatmul.mubr.msk.bf16.vlgmr.msra.gmra.mrb[12].mxu0 %vm65_vm1, %v1291_v36 }
 0x37c   :  { %1066 = vmatpush3.bf16.msra.mxu0 %v1278_v7  ;;  %1069 = vmatprep.mubr.msk.bf16.mxu0 %vm1173_vm0, %v1172_v1 }
 0x37d   :  { %1067 = vmatprep.subr.bf16.mxu0 %v1172_v1 }
 0x380   :  { %1068 = vmatpush3.bf16.msra.mxu0 %v1142_v37 }
 0x381   :  { %1079 = vmatprep.subr.bf16.mxu0 %v1172_v1 }
 0x446   :  { %v339_v4 = vpop.f32.mrb[8].mxu0 }
 0x447   :  { %v1045_v5 = vpop.f32.mrb[9].mxu0  ;;  %v346_v7 = vmax.f32 %v339_v4, 0.0 }
 0x448   :  { %v342_v6 = vpop.f32.mrb[10].mxu0 }
 0x449   :  { %v347_v8 = vmax.f32 %v342_v6, 0.0  ;;  %v1046_v9 = vpop.f32.mrb[11].mxu0 }
 0x44b   :  { %v348_v10 = vpack.c.bf16 %v347_v8, %v346_v7 }
 0x44d   :  { %1056 = vmatmul.mubr.msk.bf16.vlgmr.msra.gmra.mrb[8].mxu1 %vm354_vm5, %v348_v10 }
 0x44e   :  { %v498_v11 = vpop.f32.mrb[12].mxu0  ;;  %1075 = vmatprep.mubr.msk.bf16.mxu1 %vm1173_vm0, %v1172_v1 }
 0x44f   :  { %v1063_v12 = vpop.f32.mrb[13].mxu0 }
 0x450   :  { %v501_v13 = vpop.f32.mrb[14].mxu0 }
 0x451   :  { %v505_v14 = vpack.c.bf16 %v501_v13, %v498_v11  ;;  %v1064_v15 = vpop.f32.mrb[15].mxu0 }
 0x453   :  { %1070 = vmatmul.mubr.msk.bf16.vlgmr.msra.gmra.mrb[16].mxu0 %vm196_vm2, %v505_v14 }
 0x454   :  { %1080 = vmatpush3.bf16.msra.mxu0 %v1308_v43  ;;  %1083 = vmatprep.mubr.msk.bf16.mxu0 %vm1173_vm0, %v1172_v1 }
 0x455   :  { %1081 = vmatprep.subr.bf16.mxu0 %v1172_v1 }
 0x458   :  { %1082 = vmatpush3.bf16.msra.mxu0 %v1144_v51 }
 0x459   :  { %1099 = vmatprep.subr.bf16.mxu0 %v1172_v1 }
 0x520   :  { %v446_v16 = vpop.f32.mrb[8].mxu1 }
 0x521   :  { %v1057_v17 = vpop.f32.mrb[9].mxu1 }
 0x522   :  { %v449_v18 = vpop.f32.mrb[10].mxu1 }
 0x523   :  { %v1058_v19 = vpop.f32.mrb[11].mxu1 }
 0x526   :  { %v543_v20 = vpop.f32.mrb[16].mxu0 }
 0x527   :  { %v1071_v21 = vpop.f32.mrb[17].mxu0  ;;  %v550_v23 = vmax.f32 %v543_v20, 0.0 }
 0x528   :  { %v546_v22 = vpop.f32.mrb[18].mxu0 }
 0x529   :  { %v551_v24 = vmax.f32 %v546_v22, 0.0  ;;  %v1072_v25 = vpop.f32.mrb[19].mxu0 }
 0x52b   :  { %v552_v26 = vpack.c.bf16 %v551_v24, %v550_v23 }
 0x52d   :  { %1074 = vmatpush3.bf16.msra.mxu1 %v552_v26 }
 0x52e   :  { %1087 = vmatprep.subr.bf16.mxu1 %v1172_v1 }
 0x530   :  { %1076 = vmatmul.mubr.msk.bf16.vlgmr.msra.gmra.mrb[12].mxu1 %vm65_vm1, %v1291_v36 }
 0x531   :  { %1088 = vmatpush3.bf16.msra.mxu1 %v363_v58  ;;  %1089 = vmatprep.mubr.msk.bf16.mxu1 %vm1173_vm0, %v1172_v1 }
 0x532   :  { %1093 = vmatprep.subr.bf16.mxu1 %v1172_v1 }
 0x538   :  { %1090 = vmatmul.mubr.msk.bf16.vlgmr.msra.gmra.mrb[16].mxu1 %vm354_vm5, %v645_v29 }
 0x539   :  { %1094 = vmatpush3.bf16.msra.mxu1 %v410_v3  ;;  %1095 = vmatprep.mubr.msk.bf16.mxu1 %vm1173_vm0, %v1172_v1 }
 0x53a   :  { %1111 = vmatprep.subr.bf16.mxu1 %v1172_v1 }
 0x603   :  { %v587_v30 = vpop.f32.mrb[12].mxu1 }
 0x604   :  { %v1077_v31 = vpop.f32.mrb[13].mxu1 }
 0x605   :  { %v590_v32 = vpop.f32.mrb[14].mxu1 }
 0x606   :  { %v594_v33 = vpack.c.bf16 %v590_v32, %v587_v30  ;;  %v1078_v34 = vpop.f32.mrb[15].mxu1 }
 0x608   :  { %1084 = vmatmul.mubr.msk.bf16.vlgmr.msra.gmra.mrb[20].mxu0 %vm196_vm2, %v594_v33 }
 0x609   :  { %1101 = vmatprep.mubr.msk.bf16.mxu0 %vm1173_vm0, %v1172_v1 }
 0x6db   :  { %v632_v35 = vpop.f32.mrb[20].mxu0 }
 0x6dc   :  { %v1085_v37 = vpop.f32.mrb[21].mxu0  ;;  %v639_v39 = vmax.f32 %v632_v35, 0.0 }
 0x6dd   :  { %v635_v38 = vpop.f32.mrb[22].mxu0 }
 0x6de   :  { %v640_v40 = vmax.f32 %v635_v38, 0.0  ;;  %v1086_v41 = vpop.f32.mrb[23].mxu0 }
 0x6e0   :  { %v641_v42 = vpack.c.bf16 %v640_v40, %v639_v39 }
 0x6e2   :  { %1096 = vmatmul.mubr.msk.bf16.vlgmr.msra.gmra.mrb[16].mxu1 %vm354_vm5, %v641_v42 }
 0x6e3   :  { %1115 = vmatprep.mubr.msk.bf16.mxu1 %vm1173_vm0, %v1172_v1 }
 0x7b5   :  { %v727_v43 = vpop.f32.mrb[16].mxu1 }
 0x7b6   :  { %v1097_v44 = vpop.f32.mrb[17].mxu1 }
 0x7b7   :  { %v730_v45 = vpop.f32.mrb[18].mxu1 }
 0x7b8   :  { %v1134_v46 = vpack.i.bf16 %v730_v45, %v727_v43  ;;  %v1098_v47 = vpop.f32.mrb[19].mxu1 }
 0x7ba   :  { %1135 = vrot.lane.b32.xlu1 %v1134_v46, %s1176_s4 }
 0x82c   :  { %v1136_v48 = vpop.permute.xlu1 %1135 }
 0x82d   :  { %v1138_v49 = vunpack.i.h.bf16 %v1136_v48  ;;  %v1137_v50 = vunpack.i.l.bf16 %v1136_v48 }
 0x82f   :  { %v744_v51 = vsel %vm742_vm6, %v449_v18, %v1138_v49  ;;  %v743_v52 = vsel %vm742_vm6, %v446_v16, %v1137_v50 }
 0x830   :  { %v745_v53 = vpack.c.bf16 %v744_v51, %v743_v52 }
 0x832   :  { %1100 = vmatpush3.bf16.msra.mxu0 %v745_v53 }
 0x833   :  { %1105 = vmatprep.subr.bf16.mxu0 %v1172_v1 }
 0x835   :  { %1102 = vmatmul.mubr.msk.bf16.vlgmr.msra.gmra.mrb[24].mxu0 %vm65_vm1, %v1291_v36  ;;  %v1146_v36 = vld [vmem:[%s1427_s12] sm:$0xff]   ;;  %s939_s12 = sshll.u32 %s1177_s0, 4  ;;  %s940_s12 = int_to_ptr.vmem [resolvable:$true] %s939_s12 }
 0x836   :  { %1107 = vmatprep.mubr.msk.bf16.mxu0 %vm1173_vm0, %v1172_v1  ;;  %1106 = vmatpush3.bf16.msra.mxu0 %v1145_v54  ;;  %s1148_s11 = scalar_lea.vmem %s940_s12, 32  ;;  %p1153_p1 = scmp.lt.s32.totalorder %s940_s12, %s940_s12 }
 0x837   :  { %1112 = vmatpush3.bf16.msra.mxu1 %v1146_v36  ;;  %p1149_p0 = scmp.ne.s32.totalorder %s940_s12, %s1148_s11  ;;  %p1154_p2 = scmp.lt.s32.totalorder %s1148_s11, %s1148_s11 }
 0x838   :  { %1113 = vmatprep.subr.bf16.mxu1 %v1172_v1  ;;  %v972_v1 = vld [vmem:[%s1428_s13] ss:$0 sm:$0xff] }
 0x839   :  { %p1155_p3 = por %p1154_p2, %p1153_p1 }
 0x83b   :  { %1114 = vmatpush3.bf16.msra.mxu1 %v1147_v63  ;;  %p1156_p4 = pnand %p1155_p3, %p1149_p0 }
 0x908   :  { %v780_v55 = vpop.f32.mrb[24].mxu0 }
 0x909   :  { %v1103_v56 = vpop.f32.mrb[25].mxu0  ;;  %v787_v58 = vmax.f32 %v780_v55, 0.0 }
 0x90a   :  { %v783_v57 = vpop.f32.mrb[26].mxu0 }
 0x90b   :  { %v788_v59 = vmax.f32 %v783_v57, 0.0  ;;  %v1104_v60 = vpop.f32.mrb[27].mxu0 }
 0x90d   :  { %v789_v61 = vpack.c.bf16 %v788_v59, %v787_v58 }
 0x90f   :  { %799 = vxpose.xlu1.c.b16.start.end [1/1] (short) (narrow) %v789_v61, 16 }
 0x975   :  { %v807_v62 = vpop.trf.xlu1 }
 0x976   :  { %1108 = vmatmul.mubr.msk.bf16.vlgmr.msra.gmra.mrb[28].mxu0 %vm65_vm1, %v807_v62 }
 0xa49   :  { %v858_v2 = vpop.f32.mrb[28].mxu0 }
 0xa4a   :  { %v859_v3 = vadd.f32 %v969_v0, %v858_v2  ;;  %v1109_v4 = vpop.f32.mrb[29].mxu0 }
 0xa4b   :  { %v861_v5 = vpop.f32.mrb[30].mxu0 }
 0xa4c   :  { %v864_v6 = vmax.f32 %v859_v3, 0.0  ;;  %v1110_v7 = vpop.f32.mrb[31].mxu0 }
 0xa4e   :  { %v865_v8 = vpack.c.bf16 %v864_v6, %v864_v6 }
 0xa50   :  { %1116 = vmatmul.mubr.msk.bf16.vlgmr.msra.gmra.mrb[20].mxu1 %vm196_vm2, %v865_v8 }
 0xb23   :  { %v926_v9 = vpop.f32.mrb[20].mxu1 }
 0xb24   :  { %v927_v10 = vadd.f32 %v972_v1, %v926_v9  ;;  %v1117_v11 = vpop.f32.mrb[21].mxu1 }
 0xb25   :  { %v929_v12 = vpop.f32.mrb[22].mxu1 }
 0xb26   :  { %932 = vst [vmem:[#allocation2] sm:$0x3] %v927_v10  ;;  %v1118_v13 = vpop.f32.mrb[23].mxu1 }
 0xb27   :  { %1159 = shalt.err (!%p1156_p4)
}
 0xb28   :  { %s1160_s13 = scalar_lea.hbm %s1429_s14, 32 }
 0xb29   :  { %p1161_p5 = scmp.ne.s32.totalorder %s1429_s14, %s1160_s13  ;;  %p1164_p6 = scmp.lt.u32.totalorder %s1160_s13, %s1429_s14 }
 0xb2b   :  { %p1166_p7 = pnand %p1164_p6, %p1161_p5 }
 0xb2d   :  { %1169 = shalt.err (!%p1166_p7)
}
 0xb2e   :  { %942 = dma.vmem_to_hbm [thread:$0]  %s940_s12, 32, %s1429_s14, [#allocation3]  }
 0xb2f   :  { %1170 = dma.done.wait [#allocation3], 32  }
 0xb30   :  { %1171 = vsyncadd [#allocation3], 4294967264 }
 0xb31   :  { %946 = vsyncpa [#allocation3], 1 }

</bundles_post_ra>
